<compile_context>
chip_gen: v7x
topology: tpu7x:2x2x1
jax: 0.10.0
libtpu: 0.0.40
codegen_flags: <defaults>
</compile_context>

<pallas_src>
import jax
import jax.numpy as jnp
from jax.experimental import pallas as pl
from jax.experimental.pallas import tpu as pltpu


def _round_up(x: int, m: int) -> int:
    return ((x + m - 1) // m) * m


def _fusion_kernel(x_ref, w1_ref, b1_ref, w2_ref, b2_ref, wvo_ref, bvo_ref,
                   attended_ref):
    # feature_fusion layer 1: Linear -> ReLU (atomic contribution pre-folded
    # into b1_ref; nano|macro already concatenated -> one matmul).
    h1 = jnp.dot(x_ref[...], w1_ref[...], preferred_element_type=jnp.float32)
    h1 = jnp.maximum(h1 + b1_ref[...], 0.0)                       # (TB, H) f32

    # Dropout(0.1) is identity at eval; layer 2: Linear -> ReLU.
    h2 = jnp.dot(h1.astype(w2_ref.dtype), w2_ref[...],
                 preferred_element_type=jnp.float32)
    h2 = jnp.maximum(h2 + b2_ref[...], 0.0)                       # (TB, E) f32

    # Length-1-sequence MHA == out_proj(v_proj(x)); both projections folded
    # into a single matmul (w_vo / b_vo precomputed in the wrapper).
    attended = jnp.dot(h2.astype(wvo_ref.dtype), wvo_ref[...],
                       preferred_element_type=jnp.float32) + bvo_ref[...]
    attended_ref[...] = attended.astype(attended_ref.dtype)


def prepare_fusion_params(params, atomic_dim, compute_dtype=jnp.bfloat16):
    """One-time weight re-slicing / folding (outside the forward hot path)."""
    e = params["w2"].shape[1]
    w1 = params["w1"]
    wv = params["wqkv"][:, 2 * e:]          # only V of packed in_proj is live
    bv = params["bqkv"][:, 2 * e:]
    w_vo = jnp.dot(wv, params["wo"], preferred_element_type=jnp.float32)
    b_vo = jnp.dot(bv, params["wo"], preferred_element_type=jnp.float32) + params["bo"]
    return {
        "w1_a": w1[:atomic_dim, :],                      # f32, folded into bias
        "w1_nm": w1[atomic_dim:, :].astype(compute_dtype),
        "b1": params["b1"],                              # f32
        "w2": params["w2"].astype(compute_dtype),
        "b2": params["b2"],                              # f32
        "w_vo": w_vo.astype(compute_dtype),
        "b_vo": b_vo,                                    # f32
        "wp": params["wp"], "bp": params["bp"],          # f32, used in wrapper
        "scale_weights": params["scale_weights"],
        "compute_dtype": compute_dtype,
    }


def multi_scale_fusion_forward(atomic_features, nano_features, macro_features, prep):
    """Returns dict mirroring MultiScaleFusionLayer.forward (eval mode)."""
    B = nano_features.shape[0]
    E = prep["w2"].shape[1]
    cdt = prep["compute_dtype"]

    # Batch-independent atomic contribution folded into the layer-1 bias (f32).
    atomic_mean = jnp.mean(atomic_features, axis=0, keepdims=True)       # (1, A)
    b1_eff = prep["b1"] + jnp.dot(atomic_mean, prep["w1_a"],
                                  preferred_element_type=jnp.float32)    # (1, H)

    # Single activation stream, cast to compute dtype (bf16 halves HBM traffic).
    x = jnp.concatenate([nano_features, macro_features], axis=-1).astype(cdt)
    in_dim = x.shape[1]

    # Batch tile: large (per-step overhead dominates at these tiny K/N),
    # sublane aligned; keep >= 2 grid steps for v7x megacore when possible.
    TB = min(512, _round_up(B, 8))
    if B > 16 and pl.cdiv(B, TB) < 2:
        TB = max(8, _round_up(pl.cdiv(B, 2), 8))
    grid = (pl.cdiv(B, TB),)   # no padding: ragged last block is masked

    def full_spec(arr):
        return pl.BlockSpec(arr.shape, lambda i: (0, 0))

    weight_args = (prep["w1_nm"], b1_eff, prep["w2"], prep["b2"],
                   prep["w_vo"], prep["b_vo"])

    attended = pl.pallas_call(
        _fusion_kernel,
        out_shape=jax.ShapeDtypeStruct((B, E), jnp.float32),
        grid=grid,
        in_specs=[pl.BlockSpec((TB, in_dim), lambda i: (i, 0))]
                 + [full_spec(w) for w in weight_args],
        out_specs=pl.BlockSpec((TB, E), lambda i: (i, 0)),
        compiler_params=pltpu.CompilerParams(
            dimension_semantics=("parallel",),
            vmem_limit_bytes=32 * 1024 * 1024),
    )(x, *weight_args)

    # final_predictor (out_features = 1): trivial XLA op in the wrapper instead
    # of a lane-width-1 (masked-store) kernel output.
    pred = jnp.dot(attended, prep["wp"],
                   preferred_element_type=jnp.float32) + prep["bp"]

    sw = prep["scale_weights"]
    return {
        "final_prediction": pred,
        "fused_features": attended,
        # device scalars; caller may .item() lazily (no forced host sync here)
        "scale_contributions": {
            "atomic_weight": sw[0],
            "nano_weight": sw[1],
            "macro_weight": sw[2],
        },
        # seq_len == 1 -> softmax over one key is exactly 1 for every head;
        # matches attention_weights.squeeze(1) of shape (B, 1).
        "attention_weights": jnp.ones((B, 1), jnp.float32),
    }


def init_params(key, atomic_dim, nano_dim, macro_dim):
    total = atomic_dim + nano_dim + macro_dim
    h = total // 2
    e = total // 4
    ks = jax.random.split(key, 10)

    def lin(kw, kb, fan_in, fan_out):
        # weights stored pre-transposed as (fan_in, fan_out); biases as (1, fan_out)
        w = jax.random.normal(kw, (fan_in, fan_out), jnp.float32) * 0.05
        b = jax.random.normal(kb, (1, fan_out), jnp.float32) * 0.05
        return w, b

    w1, b1 = lin(ks[0], ks[1], total, h)
    w2, b2 = lin(ks[2], ks[3], h, e)
    wqkv, bqkv = lin(ks[4], ks[5], e, 3 * e)   # packed in_proj (q|k|v)
    wo, bo = lin(ks[6], ks[7], e, e)           # out_proj
    wp, bp = lin(ks[8], ks[9], e, 1)           # final_predictor
    scale_weights = jnp.ones((3,), jnp.float32) / 3.0
    return {
        "w1": w1, "b1": b1, "w2": w2, "b2": b2,
        "wqkv": wqkv, "bqkv": bqkv, "wo": wo, "bo": bo,
        "wp": wp, "bp": bp, "scale_weights": scale_weights,
    }


def _reference_forward(atomic, nano, macro, params):
    """Pure-JAX reference mirroring the PyTorch module at eval."""
    B = nano.shape[0]
    atomic_mean = jnp.mean(atomic, axis=0, keepdims=True)
    fused = jnp.concatenate(
        [jnp.broadcast_to(atomic_mean, (B, atomic_mean.shape[1])), nano, macro], -1)
    h1 = jnp.maximum(fused @ params["w1"] + params["b1"], 0.0)
    h2 = jnp.maximum(h1 @ params["w2"] + params["b2"], 0.0)
    e = params["w2"].shape[1]
    v = h2 @ params["wqkv"][:, 2 * e:] + params["bqkv"][:, 2 * e:]
    attended = v @ params["wo"] + params["bo"]
    pred = attended @ params["wp"] + params["bp"]
    return pred, attended


if __name__ == "__main__":
    atomic_dim, nano_dim, macro_dim = 32, 16, 16   # total=64, hidden=32, embed=16, 4 heads
    n_atoms, batch = 10, 4

    key = jax.random.PRNGKey(0)
    k_param, k_a, k_n, k_m = jax.random.split(key, 4)

    params = init_params(k_param, atomic_dim, nano_dim, macro_dim)
    atomic = jax.random.normal(k_a, (n_atoms, atomic_dim), jnp.float32)
    nano = jax.random.normal(k_n, (batch, nano_dim), jnp.float32)
    macro = jax.random.normal(k_m, (batch, macro_dim), jnp.float32)

    ref_pred, ref_att = _reference_forward(atomic, nano, macro, params)

    # f32 path: tight correctness check of the algebraic folds.
    prep_f32 = prepare_fusion_params(params, atomic_dim, compute_dtype=jnp.float32)
    out = multi_scale_fusion_forward(atomic, nano, macro, prep_f32)
    jax.block_until_ready(out["final_prediction"])
    jax.block_until_ready(out["fused_features"])

    E = (atomic_dim + nano_dim + macro_dim) // 4
    assert out["final_prediction"].shape == (batch, 1)
    assert out["fused_features"].shape == (batch, E)
    assert out["attention_weights"].shape == (batch, 1)
    assert jnp.allclose(out["final_prediction"], ref_pred, atol=1e-4, rtol=1e-4)
    assert jnp.allclose(out["fused_features"], ref_att, atol=1e-4, rtol=1e-4)

    # bf16 path (default production configuration): looser tolerance.
    prep_bf16 = prepare_fusion_params(params, atomic_dim, compute_dtype=jnp.bfloat16)
    out_bf = multi_scale_fusion_forward(atomic, nano, macro, prep_bf16)
    jax.block_until_ready(out_bf["final_prediction"])
    jax.block_until_ready(out_bf["fused_features"])
    assert jnp.allclose(out_bf["final_prediction"], ref_pred, atol=3e-2, rtol=3e-2)
    assert jnp.allclose(out_bf["fused_features"], ref_att, atol=3e-2, rtol=3e-2)

    print("KERNEL_OK")
</pallas_src>

<mosaic_0001>
module attributes {stable_mosaic.version = 11 : i64} {
  func.func @_fusion_kernel(%arg0: i32, %arg1: memref<8x32xf32, #tpu.memory_space<vmem>>, %arg2: memref<32x32xf32, #tpu.memory_space<vmem>>, %arg3: memref<1x32xf32, #tpu.memory_space<vmem>>, %arg4: memref<32x16xf32, #tpu.memory_space<vmem>>, %arg5: memref<1x16xf32, #tpu.memory_space<vmem>>, %arg6: memref<16x16xf32, #tpu.memory_space<vmem>>, %arg7: memref<1x16xf32, #tpu.memory_space<vmem>>, %arg8: memref<8x16xf32, #tpu.memory_space<vmem>>) attributes {dimension_semantics = [#tpu.dimension_semantics<parallel>], iteration_bounds = array<i64: 1>, scalar_prefetch = 0 : i64, scratch_operands = 0 : i64, tpu.core_type = #tpu.core_type<tc>, window_params = [{transform_indices = @transform_0, window_bounds = array<i64: 8, 32>}, {pipeline_mode = #tpu.pipeline_mode<synchronous>, transform_indices = @transform_1, window_bounds = array<i64: 32, 32>}, {pipeline_mode = #tpu.pipeline_mode<synchronous>, transform_indices = @transform_2, window_bounds = array<i64: 1, 32>}, {pipeline_mode = #tpu.pipeline_mode<synchronous>, transform_indices = @transform_3, window_bounds = array<i64: 32, 16>}, {pipeline_mode = #tpu.pipeline_mode<synchronous>, transform_indices = @transform_4, window_bounds = array<i64: 1, 16>}, {pipeline_mode = #tpu.pipeline_mode<synchronous>, transform_indices = @transform_5, window_bounds = array<i64: 16, 16>}, {pipeline_mode = #tpu.pipeline_mode<synchronous>, transform_indices = @transform_6, window_bounds = array<i64: 1, 16>}, {transform_indices = @transform_7, window_bounds = array<i64: 8, 16>}]} {
    %c0 = arith.constant 0 : index
    %c0_0 = arith.constant 0 : index
    %0 = vector.load %arg1[%c0, %c0_0] : memref<8x32xf32, #tpu.memory_space<vmem>>, vector<8x32xf32>
    %c0_1 = arith.constant 0 : index
    %c0_2 = arith.constant 0 : index
    %1 = vector.load %arg2[%c0_1, %c0_2] : memref<32x32xf32, #tpu.memory_space<vmem>>, vector<32x32xf32>
    %cst = arith.constant dense<0.000000e+00> : vector<8x32xf32>
    %2 = tpu.matmul %0, %1, %cst {dimension_numbers = #tpu.dot_dimension_numbers<[1], [0], [0], [1], [0, 0, 1, 1], [], []>} : vector<8x32xf32>, vector<32x32xf32>, vector<8x32xf32> -> vector<8x32xf32>
    %c0_3 = arith.constant 0 : index
    %c0_4 = arith.constant 0 : index
    %3 = vector.load %arg3[%c0_3, %c0_4] : memref<1x32xf32, #tpu.memory_space<vmem>>, vector<1x32xf32>
    %4 = vector.broadcast %3 : vector<1x32xf32> to vector<8x32xf32>
    %5 = arith.addf %2, %4 : vector<8x32xf32>
    %cst_5 = arith.constant 0.000000e+00 : f32
    %6 = vector.broadcast %cst_5 : f32 to vector<8x32xf32>
    %7 = arith.maximumf %5, %6 : vector<8x32xf32>
    %c0_6 = arith.constant 0 : index
    %c0_7 = arith.constant 0 : index
    %8 = vector.load %arg4[%c0_6, %c0_7] : memref<32x16xf32, #tpu.memory_space<vmem>>, vector<32x16xf32>
    %cst_8 = arith.constant dense<0.000000e+00> : vector<8x16xf32>
    %9 = tpu.matmul %7, %8, %cst_8 {dimension_numbers = #tpu.dot_dimension_numbers<[1], [0], [0], [1], [0, 0, 1, 1], [], []>} : vector<8x32xf32>, vector<32x16xf32>, vector<8x16xf32> -> vector<8x16xf32>
    %c0_9 = arith.constant 0 : index
    %c0_10 = arith.constant 0 : index
    %10 = vector.load %arg5[%c0_9, %c0_10] : memref<1x16xf32, #tpu.memory_space<vmem>>, vector<1x16xf32>
    %11 = vector.broadcast %10 : vector<1x16xf32> to vector<8x16xf32>
    %12 = arith.addf %9, %11 : vector<8x16xf32>
    %cst_11 = arith.constant 0.000000e+00 : f32
    %13 = vector.broadcast %cst_11 : f32 to vector<8x16xf32>
    %14 = arith.maximumf %12, %13 : vector<8x16xf32>
    %c0_12 = arith.constant 0 : index
    %c0_13 = arith.constant 0 : index
    %15 = vector.load %arg6[%c0_12, %c0_13] : memref<16x16xf32, #tpu.memory_space<vmem>>, vector<16x16xf32>
    %cst_14 = arith.constant dense<0.000000e+00> : vector<8x16xf32>
    %16 = tpu.matmul %14, %15, %cst_14 {dimension_numbers = #tpu.dot_dimension_numbers<[1], [0], [0], [1], [0, 0, 1, 1], [], []>} : vector<8x16xf32>, vector<16x16xf32>, vector<8x16xf32> -> vector<8x16xf32>
    %c0_15 = arith.constant 0 : index
    %c0_16 = arith.constant 0 : index
    %17 = vector.load %arg7[%c0_15, %c0_16] : memref<1x16xf32, #tpu.memory_space<vmem>>, vector<1x16xf32>
    %18 = vector.broadcast %17 : vector<1x16xf32> to vector<8x16xf32>
    %19 = arith.addf %16, %18 : vector<8x16xf32>
    %c0_17 = arith.constant 0 : index
    %c0_18 = arith.constant 0 : index
    %20 = vector.load %arg8[%c0_17, %c0_18] : memref<8x16xf32, #tpu.memory_space<vmem>>, vector<8x16xf32>
    tpu.vector_store %arg8[%c0_17, %c0_18], %19 {strides = array<i32>} : memref<8x16xf32, #tpu.memory_space<vmem>>, vector<8x16xf32>,
    return
  }
  func.func @transform_0(%arg0: i32) -> (i32, i32) {
    %c0_i32 = arith.constant 0 : i32
    %c0_i32_0 = arith.constant 0 : i32
    return %arg0, %c0_i32 : i32, i32
  }
  func.func @transform_1(%arg0: i32) -> (i32, i32) {
    %c0_i32 = arith.constant 0 : i32
    %c0_i32_0 = arith.constant 0 : i32
    %c0_i32_1 = arith.constant 0 : i32
    return %c0_i32, %c0_i32_0 : i32, i32
  }
  func.func @transform_2(%arg0: i32) -> (i32, i32) {
    %c0_i32 = arith.constant 0 : i32
    %c0_i32_0 = arith.constant 0 : i32
    %c0_i32_1 = arith.constant 0 : i32
    return %c0_i32, %c0_i32_0 : i32, i32
  }
  func.func @transform_3(%arg0: i32) -> (i32, i32) {
    %c0_i32 = arith.constant 0 : i32
    %c0_i32_0 = arith.constant 0 : i32
    %c0_i32_1 = arith.constant 0 : i32
    return %c0_i32, %c0_i32_0 : i32, i32
  }
  func.func @transform_4(%arg0: i32) -> (i32, i32) {
    %c0_i32 = arith.constant 0 : i32
    %c0_i32_0 = arith.constant 0 : i32
    %c0_i32_1 = arith.constant 0 : i32
    return %c0_i32, %c0_i32_0 : i32, i32
  }
  func.func @transform_5(%arg0: i32) -> (i32, i32) {
    %c0_i32 = arith.constant 0 : i32
    %c0_i32_0 = arith.constant 0 : i32
    %c0_i32_1 = arith.constant 0 : i32
    return %c0_i32, %c0_i32_0 : i32, i32
  }
  func.func @transform_6(%arg0: i32) -> (i32, i32) {
    %c0_i32 = arith.constant 0 : i32
    %c0_i32_0 = arith.constant 0 : i32
    %c0_i32_1 = arith.constant 0 : i32
    return %c0_i32, %c0_i32_0 : i32, i32
  }
  func.func @transform_7(%arg0: i32) -> (i32, i32) {
    %c0_i32 = arith.constant 0 : i32
    %c0_i32_0 = arith.constant 0 : i32
    return %arg0, %c0_i32 : i32, i32
  }
}

</mosaic_0001>

<bundles_post_ra>
// kernel: tpu_custom_call.1
= control target key start
LH: loop header
LB: loop body
LE: loop exit
PB: predicated region body
PF: predicated region fallthrough
CT: control target
= control target key end

     0   :  { %12 = vsyncpa [#allocation3], 0  ;;  %s551_s0 = inlined_call_operand.hbm [shape: f32[4,32], index: 0, kind: input, shape index: {}]   ;;  %s552_s1 = inlined_call_operand.vmem [shape: f32[32,32], index: 1, kind: input, shape index: {}]   ;;  %s553_s2 = inlined_call_operand.vmem [shape: f32[1,32], index: 2, kind: input, shape index: {}]   ;;  %s554_s3 = inlined_call_operand.vmem [shape: f32[32,16], index: 3, kind: input, shape index: {}]   ;;  %s555_s4 = inlined_call_operand.vmem [shape: f32[1,16], index: 4, kind: input, shape index: {}]   ;;  %s556_s5 = inlined_call_operand.vmem [shape: f32[16,16], index: 5, kind: input, shape index: {}]   ;;  %s557_s6 = inlined_call_operand.vmem [shape: f32[1,16], index: 6, kind: input, shape index: {}]   ;;  %s558_s7 = inlined_call_operand.hbm [shape: f32[4,16], index: 7, kind: output, shape index: {}]  }
   0x1   :  { %13 = vsyncpa [#allocation4], 0 }
   0x2   :  { %18 = vsyncadd [#allocation3], 64  ;;  %s432_s24 = smov [#allocation2]   ;;  %s384_s28 = scalar_lea.hbm %s551_s0, 64 }
   0x3   :  { %s19_s25 = sshll.u32 %s432_s24, 4  ;;  %p385_p0 = scmp.ne.s32.totalorder %s551_s0, %s384_s28  ;;  %s20_s25 = int_to_ptr.vmem [resolvable:$true] %s19_s25 }
   0x4   :  { %p388_p1 = scmp.lt.u32.totalorder %s384_s28, %s551_s0 }
   0x6   :  { %p390_p2 = pnand %p388_p1, %p385_p0 }
   0x8   :  { %393 = shalt.err (!%p390_p2)
}
   0x9   :  { %s394_s10 = scalar_lea.vmem %s20_s25, 64  ;;  %s398_s11 = scalar_lea.vmem %s20_s25, 128 }
   0xa   :  { %p395_p3 = scmp.ne.s32.totalorder %s20_s25, %s394_s10  ;;  %p399_p4 = scmp.lt.s32.totalorder %s20_s25, %s20_s25 }
   0xb   :  { %p400_p5 = scmp.lt.s32.totalorder %s398_s11, %s394_s10 }
   0xd   :  { %p401_p6 = por %p400_p5, %p399_p4 }
   0xf   :  { %p402_p7 = pnand %p401_p6, %p395_p3 }
  0x11   :  { %405 = shalt.err (!%p402_p7)
}
  0x12   :  { %s433_s12 = smov 64   ;;  %s434_s13 = smov 4  }
  0x13   :  { %25 = dma.hbm_to_vmem [thread:$0]  %s551_s0, 64, %s20_s25, [#allocation3], %s433_s12, %s433_s12, %s434_s13  }
  0x14   :  { %428 = dma.done.wait [#allocation3], 128  }
  0x15   :  { %429 = vsyncadd [#allocation3], 4294967168  ;;  %v435_v0 = vmov 0.0|0.0   ;;  %vm436_vm0 = vmmov 0   ;;  %v437_v1 = vmov 0.0   ;;  %v42_v2 = vld [vmem:[%s552_s1] sm:$0xff] }
  0x16   :  { %362 = vmatprep.subr.bf16.mxu0 %v435_v0  ;;  %341 = vmatprep.mubr.msk.f32.mxu0 %vm436_vm0, %v437_v1  ;;  %v43_v3 = vld [vmem:[%s552_s1 + $0x8] sm:$0xff]  ;;  %v44_v4 = vld [vmem:[%s552_s1 + $0x10] sm:$0xff]  ;;  %v45_v6 = vld [vmem:[%s552_s1 + $0x18] sm:$0xff]  ;;  %vm53_vm1 = vcmask 261120   ;;  %vm222_vm2 = vcmask 130048  }
  0x17   :  { %368 = vmatprep.subr.bf16.mxu1 %v435_v0  ;;  %352 = vmatprep.mubr.msk.f32.mxu1 %vm436_vm0, %v437_v1  ;;  %v363_v5 = vpack.c.bf16 %v43_v3, %v42_v2  ;;  %v128_v7 = vld [vmem:[%s554_s3] sm:$0xff]  ;;  %v129_v8 = vld [vmem:[%s554_s3 + $0x8] sm:$0xff]  ;;  %v366_v9 = vpack.c.bf16 %v45_v6, %v44_v4  ;;  %v130_v12 = vld [vmem:[%s554_s3 + $0x10] sm:$0xff] }
  0x18   :  { %v369_v10 = vpack.c.bf16 %v129_v8, %v128_v7  ;;  %v41_v11 = vld [vmem:[#allocation2] sm:$0xff]  ;;  %v131_v13 = vld [vmem:[%s554_s3 + $0x18] sm:$0xff]  ;;  %v214_v21 = vld [vmem:[%s556_s5 + $0x8] sm:$0xff] }
  0x19   :  { %364 = vmatpush3.bf16.msra.mxu0 %v363_v5  ;;  %v372_v14 = vpack.c.bf16 %v131_v13, %v130_v12  ;;  %v314_v15 = vld [vmem:[%s553_s2] ss:$0 sm:$0xff] }
  0x1a   :  { %365 = vmatprep.subr.bf16.mxu0 %v435_v0  ;;  %370 = vmatpush3.bf16.msra.mxu1 %v369_v10  ;;  %v213_v20 = vld [vmem:[%s556_s5] sm:$0xff] }
  0x1b   :  { %371 = vmatprep.subr.bf16.mxu1 %v435_v0  ;;  %v375_v22 = vpack.c.bf16 %v214_v21, %v213_v20  ;;  %v316_v23 = vld [vmem:[%s555_s4] ss:$0 sm:$0xff] }
  0x1c   :  { %v318_v28 = vld [vmem:[%s557_s6] ss:$0 sm:$0xff] }
  0x1d   :  { %367 = vmatpush3.bf16.msra.mxu0 %v366_v9 }
  0x1e   :  { %374 = vmatprep.subr.bf16.mxu0 %v435_v0  ;;  %373 = vmatpush3.bf16.msra.mxu1 %v372_v14 }
  0x20   :  { %342 = vmatmul.mubr.msk.f32.vlgmr.msra.gmra.mrb[0].mxu0 %vm53_vm1, %v41_v11 }
  0x21   :  { %359 = vmatprep.mubr.msk.f32.mxu0 %vm436_vm0, %v437_v1  ;;  %376 = vmatpush3.bf16.msra.mxu0 %v375_v22 }
  0xf3   :  { %v123_v16 = vpop.f32.mrb[0].mxu0 }
  0xf4   :  { %v124_v17 = vadd.f32 %v314_v15, %v123_v16  ;;  %v343_v18 = vpop.f32.mrb[1].mxu0 }
  0xf6   :  { %v127_v19 = vmax.f32 %v124_v17, 0.0 }
  0xf8   :  { %353 = vmatmul.mubr.msk.f32.vlgmr.msra.gmra.mrb[0].mxu1 %vm53_vm1, %v127_v19 }
 0x1cb   :  { %v208_v24 = vpop.f32.mrb[0].mxu1 }
 0x1cc   :  { %v209_v25 = vadd.f32 %v316_v23, %v208_v24  ;;  %v354_v26 = vpop.f32.mrb[1].mxu1 }
 0x1ce   :  { %v212_v27 = vmax.f32 %v209_v25, 0.0 }
 0x1d0   :  { %360 = vmatmul.mubr.msk.f32.vlgmr.msra.gmra.mrb[2].mxu0 %vm222_vm2, %v212_v27 }
 0x2a3   :  { %v292_v29 = vpop.f32.mrb[2].mxu0 }
 0x2a4   :  { %v293_v30 = vadd.f32 %v318_v28, %v292_v29  ;;  %v361_v31 = vpop.f32.mrb[3].mxu0 }
 0x2a6   :  { %296 = vst.msk [vmem:[#allocation5] sm:$0xff] %vm222_vm2, %v293_v30 }
 0x2a7   :  { %301 = vsyncadd [#allocation4], 64  ;;  %s438_s5 = smov [#allocation5]  }
 0x2a8   :  { %s302_s17 = sshll.u32 %s438_s5, 4  ;;  %s303_s17 = int_to_ptr.vmem [resolvable:$true] %s302_s17 }
 0x2a9   :  { %s406_s18 = scalar_lea.vmem %s303_s17, 64  ;;  %s410_s4 = scalar_lea.vmem %s303_s17, 128 }
 0x2aa   :  { %p407_p8 = scmp.ne.s32.totalorder %s303_s17, %s406_s18  ;;  %p411_p9 = scmp.lt.s32.totalorder %s303_s17, %s303_s17 }
 0x2ab   :  { %p412_p10 = scmp.lt.s32.totalorder %s410_s4, %s406_s18 }
 0x2ad   :  { %p413_p11 = por %p412_p10, %p411_p9 }
 0x2af   :  { %p414_p12 = pnand %p413_p11, %p407_p8 }
 0x2b1   :  { %417 = shalt.err (!%p414_p12)
}
 0x2b2   :  { %s418_s6 = scalar_lea.hbm %s558_s7, 64 }
 0x2b3   :  { %p419_p13 = scmp.ne.s32.totalorder %s558_s7, %s418_s6  ;;  %p422_p0 = scmp.lt.u32.totalorder %s418_s6, %s558_s7 }
 0x2b5   :  { %p424_p1 = pnand %p422_p0, %p419_p13 }
 0x2b7   :  { %427 = shalt.err (!%p424_p1)
}
 0x2b8   :  { %308 = dma.vmem_to_hbm [thread:$0]  %s303_s17, 64, %s558_s7, [#allocation4], %s433_s12, %s433_s12, %s434_s13  }
 0x2b9   :  { %430 = dma.done.wait [#allocation4], 128  }
 0x2ba   :  { %431 = vsyncadd [#allocation4], 4294967168 }
 0x2bb   :  { %312 = vsyncpa [#allocation3], 1 }
 0x2bc   :  { %313 = vsyncpa [#allocation4], 1 }

</bundles_post_ra>
